<compile_context>
chip_gen: v7x
topology: tpu7x:2x2x1
jax: 0.10.0
libtpu: 0.0.40
codegen_flags: <defaults>
</compile_context>

<pallas_src>
import math

import jax
import jax.numpy as jnp
from jax.experimental import pallas as pl
from jax.experimental.pallas import tpu as pltpu


def _csf_kernel(x_ref, w_ref, o_ref):
    # One MXU matmul per row tile; K (=input_size) and N (=output_size) are full.
    o_ref[...] = jnp.dot(
        x_ref[...], w_ref[...], preferred_element_type=jnp.float32
    ).astype(o_ref.dtype)


def _sublane_multiple(dtype) -> int:
    # f32 -> 8, bf16/f16 -> 16 (sub-32-bit dtypes pack along sublanes).
    return max(8, 32 // jnp.dtype(dtype).itemsize)


_VMEM_BUDGET_BYTES = 40 << 20   # conservative: leaves headroom on v7x (64 MiB/TC)
_VMEM_LIMIT_BYTES = 48 << 20    # scoped-VMEM limit (v5e/v6e: 128 MiB phys; v7x: 64 MiB)


def class_specific_filters(x: jax.Array, output_size: int) -> jax.Array:
    """Pallas TPU implementation of ClassSpecificFilters.forward: x @ kron(I, 1)."""
    input_size = x.shape[-1]
    assert input_size % output_size == 0
    # Float-only, like the PyTorch module (v7x's MXU has no integer mode).
    assert jnp.issubdtype(x.dtype, jnp.floating), (
        "class_specific_filters: cast integer inputs to bf16/f32 first")
    fpc = input_size // output_size
    itemsize = jnp.dtype(x.dtype).itemsize

    # Same values as kron(eye(O), ones(F, 1)):  W[r, j] = (r // F == j).
    w = (jnp.arange(input_size, dtype=jnp.int32)[:, None] // fpc
         == jnp.arange(output_size, dtype=jnp.int32)[None, :]).astype(x.dtype)

    lead_shape = x.shape[:-1]
    m = int(math.prod(lead_shape)) if lead_shape else 1
    x2d = x.reshape(m, input_size)          # minor dim unchanged -> free reshape

    # --- Row-tile sizing ------------------------------------------------------
    sub = _sublane_multiple(x.dtype)
    o_pad = -(-output_size // 128) * 128    # out block is lane-padded to 128 in VMEM
    # Resident cost independent of tile_m: weight, double-buffered by Pallas.
    fixed_bytes = 2 * input_size * o_pad * itemsize
    # Per-row cost: double-buffered x block + double-buffered lane-padded out block.
    per_row_bytes = 2 * input_size * itemsize + 2 * o_pad * itemsize
    avail = max(_VMEM_BUDGET_BYTES - fixed_bytes, 0)
    budget_rows = max(sub, (avail // per_row_bytes) // sub * sub)
    # v7x: keep at least two row blocks so "parallel" can shard across both TCs.
    half_rows = max(sub, -(-((m + 1) // 2) // sub) * sub)
    tile_m = min(budget_rows, half_rows)
    if m < tile_m:
        tile_m = m                          # full-extent block; (8,128) rule satisfied

    grid_m = pl.cdiv(m, tile_m)             # uneven edge block is masked by Pallas
    # TODO(synk): for extreme input_size a K-grid with an f32 accumulator would be
    # needed to keep even one row block (plus W) inside VMEM; not required here.

    out2d = pl.pallas_call(
        _csf_kernel,
        out_shape=jax.ShapeDtypeStruct((m, output_size), x.dtype),
        grid=(grid_m,),
        in_specs=[
            pl.BlockSpec((tile_m, input_size), lambda i: (i, 0)),
            pl.BlockSpec((input_size, output_size), lambda i: (0, 0)),
        ],
        out_specs=pl.BlockSpec((tile_m, output_size), lambda i: (i, 0)),
        compiler_params=pltpu.CompilerParams(
            dimension_semantics=("parallel",),
            vmem_limit_bytes=_VMEM_LIMIT_BYTES,
        ),
    )(x2d, w)

    return out2d.reshape(*lead_shape, output_size)


if __name__ == "__main__":
    key = jax.random.PRNGKey(0)
    # Shapes implied by the forward: features along the last dim.
    # batch=2, seq=8, input_size=32 (hidden), output_size=4 -> filters_per_class=8.
    batch, seq, input_size, output_size = 2, 8, 32, 4
    x = jax.random.normal(key, (batch, seq, input_size), dtype=jnp.float32)

    y = class_specific_filters(x, output_size)
    jax.block_until_ready(y)

    # Reference 1: literal x @ kron(eye(O), ones(F,1)) (the PyTorch module).
    fpc = input_size // output_size
    w_ref = jnp.kron(jnp.eye(output_size, dtype=x.dtype),
                     jnp.ones((fpc, 1), dtype=x.dtype))
    y_ref = x @ w_ref
    # Reference 2: equivalent grouped sum over consecutive input features.
    y_ref2 = x.reshape(batch, seq, output_size, fpc).sum(-1)

    assert y.shape == (batch, seq, output_size) and y.dtype == x.dtype
    assert jnp.allclose(y, y_ref, atol=1e-5, rtol=1e-5), "mismatch vs matmul reference"
    assert jnp.allclose(y, y_ref2, atol=1e-5, rtol=1e-5), "mismatch vs group-sum reference"

    print("KERNEL_OK")
</pallas_src>

<mosaic_0001>
module attributes {stable_mosaic.version = 11 : i64} {
  func.func @_csf_kernel(%arg0: i32, %arg1: memref<8x32xf32, #tpu.memory_space<vmem>>, %arg2: memref<32x4xf32, #tpu.memory_space<vmem>>, %arg3: memref<8x4xf32, #tpu.memory_space<vmem>>) attributes {dimension_semantics = [#tpu.dimension_semantics<parallel>], iteration_bounds = array<i64: 2>, scalar_prefetch = 0 : i64, scratch_operands = 0 : i64, tpu.core_type = #tpu.core_type<tc>, window_params = [{transform_indices = @transform_0, window_bounds = array<i64: 8, 32>}, {pipeline_mode = #tpu.pipeline_mode<synchronous>, transform_indices = @transform_1, window_bounds = array<i64: 32, 4>}, {transform_indices = @transform_2, window_bounds = array<i64: 8, 4>}]} {
    %c0 = arith.constant 0 : index
    %c0_0 = arith.constant 0 : index
    %0 = vector.load %arg1[%c0, %c0_0] : memref<8x32xf32, #tpu.memory_space<vmem>>, vector<8x32xf32>
    %c0_1 = arith.constant 0 : index
    %c0_2 = arith.constant 0 : index
    %1 = vector.load %arg2[%c0_1, %c0_2] : memref<32x4xf32, #tpu.memory_space<vmem>>, vector<32x4xf32>
    %cst = arith.constant dense<0.000000e+00> : vector<8x4xf32>
    %2 = tpu.matmul %0, %1, %cst {dimension_numbers = #tpu.dot_dimension_numbers<[1], [0], [0], [1], [0, 0, 1, 1], [], []>} : vector<8x32xf32>, vector<32x4xf32>, vector<8x4xf32> -> vector<8x4xf32>
    %c0_3 = arith.constant 0 : index
    %c0_4 = arith.constant 0 : index
    %3 = vector.load %arg3[%c0_3, %c0_4] : memref<8x4xf32, #tpu.memory_space<vmem>>, vector<8x4xf32>
    tpu.vector_store %arg3[%c0_3, %c0_4], %2 {strides = array<i32>} : memref<8x4xf32, #tpu.memory_space<vmem>>, vector<8x4xf32>,
    return
  }
  func.func @transform_0(%arg0: i32) -> (i32, i32) {
    %c0_i32 = arith.constant 0 : i32
    %c0_i32_0 = arith.constant 0 : i32
    return %arg0, %c0_i32 : i32, i32
  }
  func.func @transform_1(%arg0: i32) -> (i32, i32) {
    %c0_i32 = arith.constant 0 : i32
    %c0_i32_0 = arith.constant 0 : i32
    %c0_i32_1 = arith.constant 0 : i32
    return %c0_i32, %c0_i32_0 : i32, i32
  }
  func.func @transform_2(%arg0: i32) -> (i32, i32) {
    %c0_i32 = arith.constant 0 : i32
    %c0_i32_0 = arith.constant 0 : i32
    return %arg0, %c0_i32 : i32, i32
  }
}

</mosaic_0001>

<bundles_post_ra>
// kernel: tpu_custom_call.1
= control target key start
LH: loop header
LB: loop body
LE: loop exit
PB: predicated region body
PF: predicated region fallthrough
CT: control target
= control target key end

     0   :  { %s342_s9 = smov 0   ;;  %s371_s0 = inlined_call_operand.vmem [shape: f32[16,32], index: 0, kind: input, shape index: {}]   ;;  %s372_s1 = inlined_call_operand.vmem [shape: f32[32,4], index: 1, kind: input, shape index: {}]   ;;  %s373_s2 = inlined_call_operand.vmem [shape: f32[16,4], index: 2, kind: output, shape index: {}]  }
   0x1 LB: > { %s273_s10 = sadd.s32 4294967295, %s322_s9   ;;  %p277_p0 = scmp.ge.s32.totalorder %s322_s9, 1  ;;  %s322_s9 = sphi %s342_s9, %s12_s9  }
   0x2   : > { %p111_p1 = scmp.lt.s32.totalorder %s322_s9, 3 }
   0x4   : > { %p112_p2 = pnand %p277_p0, %p111_p1 }
   0x5   : > { %v140_v0 = vld [vmem:[%s372_s1] sm:$0xff] (!%p112_p2)  ;;  %v141_v1 = vld [vmem:[%s372_s1 + $0x8] sm:$0xff] (!%p112_p2)  ;;  %v142_v2 = vld [vmem:[%s372_s1 + $0x10] sm:$0xff] (!%p112_p2)  ;;  %v324_v3 = vmov (!%p112_p2), 0.0|0.0   ;;  %vm325_vm0 = vmmov (!%p112_p2), 0   ;;  %v326_v6 = vmov (!%p112_p2), 0.0  }
   0x6   : > { %115 = sbr.rel (%p112_p2) target bundleno = 230 (0xe6), region = 28  ;;  %299 = vmatprep.subr.bf16.mxu0 (!%p112_p2), %v324_v3  ;;  %v300_v4 = vpack.c.bf16 (!%p112_p2), %v141_v1, %v140_v0  ;;  %v143_v5 = vld [vmem:[%s372_s1 + $0x18] sm:$0xff] (!%p112_p2)  ;;  %296 = vmatprep.mubr.msk.f32.mxu0 (!%p112_p2), %vm325_vm0, %v326_v6  ;;  %p131_p3 = scmp.lt.s32.totalorder (!%p112_p2), %s273_s10, 1  ;;  %vm144_vm1 = vcmask (!%p112_p2), 261120   ;;  %vm218_vm2 = vcmask (!%p112_p2), 31744  }
   0x7   : > { %v303_v7 = vpack.c.bf16 (!%p112_p2), %v143_v5, %v142_v2 }
   0x8   : > { %301 = vmatpush3.bf16.msra.mxu0 (!%p112_p2), %v300_v4 }
   0x9   : > { %302 = vmatprep.subr.bf16.mxu0 (!%p112_p2), %v324_v3 }
   0xc   : > { %304 = vmatpush3.bf16.msra.mxu0 (!%p112_p2), %v303_v7 }
   0xd   : > { %s375_s10 = smov (!%p131_p3, %s273_s10), 1 }
   0xe   : > { %s278_s19 = sshll.u32 %s375_s10, 3 }
   0xf   : > { %s134_s22 = scalar_lea.vmem %s371_s0, %s278_s19  ;;  %s138_s25 = scalar_lea.vmem %s373_s2, %s278_s19 }
  0x10   : > { %v139_v8 = vld [vmem:[%s134_s22] sm:$0xff] }
  0x11   : > { %297 = vmatmul.mubr.msk.f32.vlgmr.msra.gmra.mrb[0].mxu0 %vm144_vm1, %v139_v8 }
  0xe4   : > { %v214_v9 = vpop.f32.mrb[0].mxu0 }
  0xe5   : > { %219 = vst.msk [vmem:[%s138_s25] sm:$0xff] %vm218_vm2, %v214_v9  ;;  %v298_v10 = vpop.f32.mrb[1].mxu0 }
  0xe6 PF: > { %s12_s9 = sadd.s32 1, %s322_s9  }
  0xe7   : > { %p9_p4 = scmp.ge.s32.totalorder %s12_s9, 4  }
  0xe9   :  { %11 = sbr.rel (!%p9_p4) target bundleno = 1 (0x1), region = 58 }

</bundles_post_ra>
